<compile_context>
chip_gen: v7x
topology: tpu7x:2x2x1
jax: 0.10.0
libtpu: 0.0.40
codegen_flags: <defaults>
</compile_context>

<pallas_src>
import functools

import jax
import jax.numpy as jnp
from jax import lax
from jax.experimental import pallas as pl
from jax.experimental.pallas import tpu as pltpu


def _sublanes_for(dtype):
    """Sublane packing for a dtype: 8 (4-byte), 16 (2-byte), 32 (1-byte)."""
    return max(8, 32 // max(1, jnp.dtype(dtype).itemsize))


def _round_up(a, b):
    return -(-a // b) * b


def _sse_block_kernel(x_ref, y_ref, out_ref, acc_ref, *, rows_total, block_rows,
                      k_axis, mask_needed, slab_rows, full_slabs, rem_rows):
    """Accumulate the per-lane sum of squared diffs of one (block_rows, lanes) tile."""
    p = pl.program_id(0)
    k = pl.program_id(1)
    lanes = x_ref.shape[-1]

    @pl.when(k == 0)
    def _init():
        acc_ref[...] = jnp.zeros_like(acc_ref)

    # Global (UNCLAMPED) block index / first array row covered by this step.
    # For the (at most one) overflow step of the 2-way parallel split,
    # row0 >= rows_total, so every row is masked out and the step adds 0.
    blk = p * k_axis + k
    row0 = blk * block_rows

    def slab_sse(r, nrows):
        # Rows [r, r+nrows) of the tile, folded to a vreg-shaped (8, lanes) slab
        # with pure VPU adds (no XLU scalar reduce, no masked scalar stores).
        xs = x_ref[pl.ds(r, nrows), :].astype(jnp.float32)
        ys = y_ref[pl.ds(r, nrows), :].astype(jnp.float32)
        d = xs - ys
        sq = d * d
        if mask_needed:
            rid = lax.broadcasted_iota(jnp.int32, sq.shape, 0) + (row0 + r)
            sq = jnp.where(rid < rows_total, sq, 0.0)
        return sq.reshape(nrows // 8, 8, lanes).sum(axis=0)

    def body(s, carry):
        r = pl.multiple_of(s * slab_rows, slab_rows)
        return carry + slab_sse(r, slab_rows)

    part = lax.fori_loop(0, full_slabs, body, jnp.zeros((8, lanes), jnp.float32))
    if rem_rows:
        part = part + slab_sse(full_slabs * slab_rows, rem_rows)
    acc_ref[...] += part

    @pl.when(k == k_axis - 1)
    def _finalize():
        out_ref[...] = acc_ref[...]


def mse_loss_pallas(x, y, *, lanes=512, target_block_bytes=4 << 20):
    """Mean squared error between x and y via a tiled Pallas reduction.

    No full-array padding/copies: lanes-aligned data is reshaped in place, the
    ragged tail (< lanes elements) is reduced in plain JAX, and uneven row
    blocks are masked in-kernel. Returns a scalar float32.
    """
    assert x.shape == y.shape, "x and y must have the same shape"
    n = x.size
    if n == 0:
        return jnp.float32(0.0)

    xf = x.reshape(-1)
    yf = y.reshape(-1)
    itemsize = max(jnp.dtype(x.dtype).itemsize, jnp.dtype(y.dtype).itemsize)
    sub = max(_sublanes_for(x.dtype), _sublanes_for(y.dtype))

    rows = n // lanes               # full lane-rows
    tail = n - rows * lanes         # ragged tail, < lanes elements

    # Tiny inputs (< one sublane-aligned row block, <= ~16 KiB): plain JAX.
    if rows < sub:
        d = xf.astype(jnp.float32) - yf.astype(jnp.float32)
        return jnp.sum(d * d) / n

    tail_sse = jnp.float32(0.0)
    if tail:
        # Tail handled outside the kernel; only the aligned prefix is reshaped.
        dt = xf[rows * lanes:].astype(jnp.float32) - yf[rows * lanes:].astype(jnp.float32)
        tail_sse = jnp.sum(dt * dt)
        xm = xf[: rows * lanes].reshape(rows, lanes)
        ym = yf[: rows * lanes].reshape(rows, lanes)
    else:
        xm = xf.reshape(rows, lanes)   # pure metadata reshape, zero-copy
        ym = yf.reshape(rows, lanes)

    # Constant-byte tiles across dtypes: ~target_block_bytes per input block
    # (2048 f32 / 4096 bf16 / 8192 int8 rows at lanes=512).
    target_rows = max(sub, (target_block_bytes // (lanes * itemsize)) // sub * sub)
    block_rows = min(target_rows, (rows // sub) * sub)   # <= rows, multiple of sub
    # Stream each block in <=8 row slabs so in-kernel f32 temps stay small.
    slab_rows = _round_up(max(block_rows // 8, sub), sub)
    full_slabs = block_rows // slab_rows
    rem_rows = block_rows - full_slabs * slab_rows        # multiple of sub

    num_blocks = -(-rows // block_rows)
    # Leading "parallel" axis: 2-way split of the row blocks so v7x's two
    # TensorCores each stream half the rows. With the clamped index_map +
    # in-kernel mask there is no padded-block DMA waste, so it is harmless (a
    # plain serial loop) on single-TC chips (v5e/v6e).
    p_axis = 2 if num_blocks >= 2 else 1
    k_axis = -(-num_blocks // p_axis)
    overflow = p_axis * k_axis > num_blocks               # at most one extra step
    mask_needed = p_axis * k_axis * block_rows != rows

    def in_map(p, k):
        blk = p * k_axis + k
        if overflow:
            # Clamp so the single overflow step reuses the previous step's
            # block (Pallas skips the DMA when the block index is unchanged);
            # its contribution is masked to zero in-kernel.
            blk = jnp.minimum(blk, num_blocks - 1)
        return (blk, 0)

    kernel = functools.partial(
        _sse_block_kernel, rows_total=rows, block_rows=block_rows, k_axis=k_axis,
        mask_needed=mask_needed, slab_rows=slab_rows, full_slabs=full_slabs,
        rem_rows=rem_rows)

    partials = pl.pallas_call(
        kernel,
        out_shape=jax.ShapeDtypeStruct((p_axis * 8, lanes), jnp.float32),
        grid_spec=pltpu.PrefetchScalarGridSpec(
            num_scalar_prefetch=0,
            grid=(p_axis, k_axis),
            in_specs=[
                pl.BlockSpec((block_rows, lanes), in_map),
                pl.BlockSpec((block_rows, lanes), in_map),
            ],
            out_specs=pl.BlockSpec((8, lanes), lambda p, k: (p, 0)),
            scratch_shapes=[pltpu.VMEM((8, lanes), jnp.float32)],
        ),
        compiler_params=pltpu.CompilerParams(
            dimension_semantics=("parallel", "arbitrary"),
            vmem_limit_bytes=48 << 20,
        ),
        cost_estimate=pl.CostEstimate(
            flops=3 * rows * lanes,
            transcendentals=0,
            bytes_accessed=2 * rows * lanes * itemsize + p_axis * 8 * lanes * 4,
        ),
    )(xm, ym)

    # Tiny (16-32 KiB) lane-dense follow-up reduce + the ragged-tail term.
    return (jnp.sum(partials) + tail_sse) / n


def custorm_loss(x, y):
    """Exact semantic match of the reference forward(): body is `pass`."""
    return None


if __name__ == "__main__":
    key = jax.random.PRNGKey(0)
    keys = jax.random.split(key, 10)

    # Case 1: small NCHW f32 feature maps; lanes-aligned -> zero-copy, single block.
    x = jax.random.normal(keys[0], (2, 4, 32, 32), dtype=jnp.float32)
    y = jax.random.normal(keys[1], (2, 4, 32, 32), dtype=jnp.float32)
    assert custorm_loss(x, y) is None   # reference forward() semantics
    loss = mse_loss_pallas(x, y)
    jax.block_until_ready(loss)
    ref = jnp.mean((x - y) ** 2)
    assert jnp.allclose(loss, ref, rtol=1e-5, atol=1e-6), (loss, ref)

    # Case 2: ragged bf16 shape (exercises plain-JAX tail path + native-width DMA).
    xb = jax.random.normal(keys[2], (2, 3, 7, 197), dtype=jnp.bfloat16)
    yb = jax.random.normal(keys[3], (2, 3, 7, 197), dtype=jnp.bfloat16)
    loss_b = mse_loss_pallas(xb, yb)
    jax.block_until_ready(loss_b)
    ref_b = jnp.mean((xb.astype(jnp.float32) - yb.astype(jnp.float32)) ** 2)
    assert jnp.allclose(loss_b, ref_b, rtol=1e-4, atol=1e-5), (loss_b, ref_b)

    # Case 3: multi-block grid with 2-way parallel axis and a masked partial last
    # block (rows=200, block=64), forced via a small target_block_bytes.
    xc = jax.random.normal(keys[4], (2, 4, 128, 100), dtype=jnp.float32)
    yc = jax.random.normal(keys[5], (2, 4, 128, 100), dtype=jnp.float32)
    loss_c = mse_loss_pallas(xc, yc, target_block_bytes=64 * 512 * 4)
    jax.block_until_ready(loss_c)
    ref_c = jnp.mean((xc - yc) ** 2)
    assert jnp.allclose(loss_c, ref_c, rtol=1e-5, atol=1e-6), (loss_c, ref_c)

    # Case 4: odd number of data blocks (rows=150, block=64 -> 3 blocks on a
    # 2x2 grid): exercises the clamped-index-map overflow step + masking.
    xd = jax.random.normal(keys[6], (2, 4, 96, 100), dtype=jnp.float32)
    yd = jax.random.normal(keys[7], (2, 4, 96, 100), dtype=jnp.float32)
    loss_d = mse_loss_pallas(xd, yd, target_block_bytes=64 * 512 * 4)
    jax.block_until_ready(loss_d)
    ref_d = jnp.mean((xd - yd) ** 2)
    assert jnp.allclose(loss_d, ref_d, rtol=1e-5, atol=1e-6), (loss_d, ref_d)

    # Case 5: tiny inputs route through the plain-JAX fallback (no kernel launch).
    xe = jax.random.normal(keys[8], (2, 3, 5, 7), dtype=jnp.float32)
    ye = jax.random.normal(keys[9], (2, 3, 5, 7), dtype=jnp.float32)
    loss_e = mse_loss_pallas(xe, ye)
    jax.block_until_ready(loss_e)
    ref_e = jnp.mean((xe - ye) ** 2)
    assert jnp.allclose(loss_e, ref_e, rtol=1e-5, atol=1e-6), (loss_e, ref_e)

    print("KERNEL_OK")
</pallas_src>

<mosaic_0001>
module attributes {stable_mosaic.version = 11 : i64} {
  func.func @_sse_block_kernel(%arg0: i32, %arg1: i32, %arg2: memref<16x512xf32, #tpu.memory_space<vmem>>, %arg3: memref<16x512xf32, #tpu.memory_space<vmem>>, %arg4: memref<8x512xf32, #tpu.memory_space<vmem>>, %arg5: memref<8x512xf32, #tpu.memory_space<vmem>>) attributes {dimension_semantics = [#tpu.dimension_semantics<parallel>, #tpu.dimension_semantics<arbitrary>], iteration_bounds = array<i64: 1, 1>, scalar_prefetch = 0 : i64, scratch_operands = 1 : i64, tpu.core_type = #tpu.core_type<tc>, window_params = [{transform_indices = @transform_0, window_bounds = array<i64: 16, 512>}, {transform_indices = @transform_1, window_bounds = array<i64: 16, 512>}, {transform_indices = @transform_2, window_bounds = array<i64: 8, 512>}]} {
    %c0_i32 = arith.constant 0 : i32
    %0 = arith.cmpi eq, %arg1, %c0_i32 : i32
    %1 = arith.extui %0 : i1 to i32
    %c0_i32_0 = arith.constant 0 : i32
    %2 = arith.cmpi ne, %1, %c0_i32_0 : i32
    scf.if %2 {
      %cst_8 = arith.constant 0.000000e+00 : f32
      %12 = vector.broadcast %cst_8 : f32 to vector<8x512xf32>
      %c0_9 = arith.constant 0 : index
      %c0_10 = arith.constant 0 : index
      %13 = vector.load %arg5[%c0_9, %c0_10] : memref<8x512xf32, #tpu.memory_space<vmem>>, vector<8x512xf32>
      tpu.vector_store %arg5[%c0_9, %c0_10], %12 {strides = array<i32>} : memref<8x512xf32, #tpu.memory_space<vmem>>, vector<8x512xf32>,
    } else {
    }
    %cst = arith.constant 0.000000e+00 : f32
    %3 = vector.broadcast %cst : f32 to vector<8x512xf32>
    %c0_i32_1 = arith.constant 0 : i32
    %c2_i32 = arith.constant 2 : i32
    %4 = arith.addi %c0_i32_1, %c2_i32 : i32
    %c1_i32 = arith.constant 1 : i32
    %5 = scf.for %arg6 = %c0_i32_1 to %4 step %c1_i32 iter_args(%arg7 = %3) -> (vector<8x512xf32>)  : i32 {
      %c8_i32 = arith.constant 8 : i32
      %12 = arith.muli %arg6, %c8_i32 : i32
      %13 = tpu.assume_multiple %12, 8 : i32
      %14 = arith.index_cast %13 : i32 to index
      %c0_8 = arith.constant 0 : index
      %15 = vector.load %arg2[%14, %c0_8] : memref<16x512xf32, #tpu.memory_space<vmem>>, vector<8x512xf32>
      %16 = arith.index_cast %13 : i32 to index
      %c0_9 = arith.constant 0 : index
      %17 = vector.load %arg3[%16, %c0_9] : memref<16x512xf32, #tpu.memory_space<vmem>>, vector<8x512xf32>
      %18 = arith.subf %15, %17 : vector<8x512xf32>
      %19 = arith.mulf %18, %18 : vector<8x512xf32>
      %20 = vector.shape_cast %19 : vector<8x512xf32> to vector<1x8x512xf32>
      %cst_10 = arith.constant dense<0.000000e+00> : vector<8x512xf32>
      %21 = vector.multi_reduction <add>, %20, %cst_10 [0] : vector<1x8x512xf32> to vector<8x512xf32>
      %22 = arith.addf %arg7, %21 : vector<8x512xf32>
      scf.yield %22 : vector<8x512xf32>
    }
    %c2_i32_2 = arith.constant 2 : i32
    %c0 = arith.constant 0 : index
    %c0_3 = arith.constant 0 : index
    %6 = vector.load %arg5[%c0, %c0_3] : memref<8x512xf32, #tpu.memory_space<vmem>>, vector<8x512xf32>
    %7 = arith.addf %6, %5 : vector<8x512xf32>
    %c0_4 = arith.constant 0 : index
    %c0_5 = arith.constant 0 : index
    %8 = vector.load %arg5[%c0_4, %c0_5] : memref<8x512xf32, #tpu.memory_space<vmem>>, vector<8x512xf32>
    tpu.vector_store %arg5[%c0_4, %c0_5], %7 {strides = array<i32>} : memref<8x512xf32, #tpu.memory_space<vmem>>, vector<8x512xf32>,
    %c0_i32_6 = arith.constant 0 : i32
    %9 = arith.cmpi eq, %arg1, %c0_i32_6 : i32
    %10 = arith.extui %9 : i1 to i32
    %c0_i32_7 = arith.constant 0 : i32
    %11 = arith.cmpi ne, %10, %c0_i32_7 : i32
    scf.if %11 {
      %c0_8 = arith.constant 0 : index
      %c0_9 = arith.constant 0 : index
      %12 = vector.load %arg5[%c0_8, %c0_9] : memref<8x512xf32, #tpu.memory_space<vmem>>, vector<8x512xf32>
      %c0_10 = arith.constant 0 : index
      %c0_11 = arith.constant 0 : index
      %13 = vector.load %arg4[%c0_10, %c0_11] : memref<8x512xf32, #tpu.memory_space<vmem>>, vector<8x512xf32>
      tpu.vector_store %arg4[%c0_10, %c0_11], %12 {strides = array<i32>} : memref<8x512xf32, #tpu.memory_space<vmem>>, vector<8x512xf32>,
    } else {
    }
    return
  }
  func.func @transform_0(%arg0: i32, %arg1: i32) -> (i32, i32) {
    %c1_i32 = arith.constant 1 : i32
    %0 = arith.muli %arg0, %c1_i32 : i32
    %1 = arith.addi %0, %arg1 : i32
    %c0_i32 = arith.constant 0 : i32
    %c0_i32_0 = arith.constant 0 : i32
    return %1, %c0_i32 : i32, i32
  }
  func.func @transform_1(%arg0: i32, %arg1: i32) -> (i32, i32) {
    %c1_i32 = arith.constant 1 : i32
    %0 = arith.muli %arg0, %c1_i32 : i32
    %1 = arith.addi %0, %arg1 : i32
    %c0_i32 = arith.constant 0 : i32
    %c0_i32_0 = arith.constant 0 : i32
    return %1, %c0_i32 : i32, i32
  }
  func.func @transform_2(%arg0: i32, %arg1: i32) -> (i32, i32) {
    %c0_i32 = arith.constant 0 : i32
    %c0_i32_0 = arith.constant 0 : i32
    return %arg0, %c0_i32 : i32, i32
  }
}

</mosaic_0001>

<bundles_post_ra>
// kernel: tpu_custom_call.1
= control target key start
LH: loop header
LB: loop body
LE: loop exit
PB: predicated region body
PF: predicated region fallthrough
CT: control target
= control target key end

     0   :  { %7 = vsyncpa [#allocation4], 0  ;;  %s394_s0 = inlined_call_operand.hbm [shape: f32[16,512], index: 0, kind: input, shape index: {}]   ;;  %s395_s1 = inlined_call_operand.hbm [shape: f32[16,512], index: 1, kind: input, shape index: {}]   ;;  %s396_s2 = inlined_call_operand.hbm [shape: f32[8,512], index: 2, kind: output, shape index: {}]  }
   0x1   :  { %8 = vsyncpa [#allocation7], 0 }
   0x2   :  { %9 = vsyncpa [#allocation5], 0  ;;  %s328_s9 = smov [#allocation3]   ;;  %s216_s13 = scalar_lea.hbm %s394_s0, 1024 }
   0x3   :  { %s20_s10 = sshll.u32 %s328_s9, 4  ;;  %p217_p0 = scmp.ne.s32.totalorder %s394_s0, %s216_s13  ;;  %s21_s10 = int_to_ptr.vmem [resolvable:$true] %s20_s10 }
   0x4   :  { %p220_p1 = scmp.lt.u32.totalorder %s216_s13, %s394_s0 }
   0x6   :  { %p222_p2 = pnand %p220_p1, %p217_p0 }
   0x8   :  { %225 = shalt.err (!%p222_p2)
}
   0x9   :  { %s226_s18 = scalar_lea.vmem %s21_s10, 1024  ;;  %p231_p4 = scmp.lt.s32.totalorder %s21_s10, %s21_s10 }
   0xa   :  { %p227_p3 = scmp.ne.s32.totalorder %s21_s10, %s226_s18  ;;  %p232_p5 = scmp.lt.s32.totalorder %s226_s18, %s226_s18 }
   0xc   :  { %p233_p6 = por %p232_p5, %p231_p4 }
   0xe   :  { %p234_p7 = pnand %p233_p6, %p227_p3 }
  0x10   :  { %237 = shalt.err (!%p234_p7)
}
  0x11   :  { %s329_s19 = smov 512   ;;  %s330_s20 = smov 32  }
  0x12   :  { %26 = dma.hbm_to_vmem [thread:$0]  %s394_s0, 1024, %s21_s10, [#allocation4], %s329_s19, %s329_s19, %s330_s20  }
  0x13   :  { %s331_s23 = smov [#allocation6]   ;;  %s238_s27 = scalar_lea.hbm %s395_s1, 1024 }
  0x14   :  { %s37_s24 = sshll.u32 %s331_s23, 4  ;;  %p239_p8 = scmp.ne.s32.totalorder %s395_s1, %s238_s27  ;;  %s38_s24 = int_to_ptr.vmem [resolvable:$true] %s37_s24 }
  0x15   :  { %p242_p9 = scmp.lt.u32.totalorder %s238_s27, %s395_s1 }
  0x17   :  { %p244_p10 = pnand %p242_p9, %p239_p8 }
  0x19   :  { %247 = shalt.err (!%p244_p10)
}
  0x1a   :  { %s248_s4 = scalar_lea.vmem %s38_s24, 1024  ;;  %p253_p12 = scmp.lt.s32.totalorder %s38_s24, %s38_s24 }
  0x1b   :  { %p249_p11 = scmp.ne.s32.totalorder %s38_s24, %s248_s4  ;;  %p254_p13 = scmp.lt.s32.totalorder %s248_s4, %s248_s4 }
  0x1d   :  { %p255_p0 = por %p254_p13, %p253_p12 }
  0x1f   :  { %p256_p1 = pnand %p255_p0, %p249_p11 }
  0x21   :  { %259 = shalt.err (!%p256_p1)
}
  0x22   :  { %43 = dma.hbm_to_vmem [thread:$0]  %s395_s1, 1024, %s38_s24, [#allocation7], %s329_s19, %s329_s19, %s330_s20  }
  0x23   :  { %302 = dma.done.wait [#allocation4], 1024  }
  0x24   :  { %303 = vsyncadd [#allocation4], 4294966272 }
  0x25   :  { %304 = dma.done.wait [#allocation7], 1024  }
  0x26   :  { %305 = vsyncadd [#allocation7], 4294966272  ;;  %v332_v0 = vmov 0.0   ;;  %v308_v1 = vmov 0.0   ;;  %v312_v2 = vmov 0.0   ;;  %v316_v3 = vmov 0.0  }
  0x27   :  { %58 = vst [vmem:[#allocation2] sm:$0xff] %v332_v0  ;;  %59 = vst [vmem:[#allocation2 + $0x8] sm:$0xff] %v332_v0  ;;  %v320_v4 = vmov 0.0   ;;  %s373_s6 = smov 0  }
  0x28   :  { %60 = vst [vmem:[#allocation2 + $0x10] sm:$0xff] %v332_v0  ;;  %61 = vst [vmem:[#allocation2 + $0x18] sm:$0xff] %v332_v0 }
  0x29 LB: > { %s164_s1 = sshll.u32 %s326_s6, 3  ;;  %s67_s6 = sadd.s32 1, %s326_s6   ;;  %s326_s6 = sphi %s373_s6, %s67_s6   ;;  %v322_v4 = vphi %v320_v4, %v321_v4   ;;  %v318_v3 = vphi %v316_v3, %v317_v3   ;;  %v314_v2 = vphi %v312_v2, %v313_v2   ;;  %v310_v1 = vphi %v308_v1, %v309_v1  }
  0x2a   : > { %s73_s7 = sshra.s32 %s164_s1, 3  ;;  %p64_p2 = scmp.ge.s32.totalorder %s67_s6, 2  }
  0x2b   : > { %s168_s8 = sshll.u32 %s73_s7, 5  ;;  %s333_s11 = smov (%p64_p2), [#allocation8]  }
  0x2c   : > { %s77_s9 = scalar_lea.vmem [#allocation3], %s168_s8  ;;  %s83_s10 = scalar_lea.vmem [#allocation6], %s168_s8 }
  0x2d   : > { %v78_v5 = vld [vmem:[%s77_s9] sm:$0xff]  ;;  %v79_v6 = vld [vmem:[%s77_s9 + $0x8] sm:$0xff]  ;;  %v80_v7 = vld [vmem:[%s77_s9 + $0x10] sm:$0xff]  ;;  %s133_s12 = sshll.u32 (%p64_p2), %s333_s11, 4  ;;  %s134_s12 = int_to_ptr.vmem [resolvable:$true] %s133_s12 }
  0x2e   : > { %v81_v8 = vld [vmem:[%s77_s9 + $0x18] sm:$0xff]  ;;  %v84_v9 = vld [vmem:[%s83_s10] sm:$0xff]  ;;  %v85_v10 = vld [vmem:[%s83_s10 + $0x8] sm:$0xff]  ;;  %s260_s13 = scalar_lea.vmem (%p64_p2), %s134_s12, 512  ;;  %p265_p4 = scmp.lt.s32.totalorder (%p64_p2), %s134_s12, %s134_s12 }
  0x2f   : > { %v86_v11 = vld [vmem:[%s83_s10 + $0x10] sm:$0xff]  ;;  %v87_v12 = vld [vmem:[%s83_s10 + $0x18] sm:$0xff]  ;;  %v88_v13 = vsub.f32 %v78_v5, %v84_v9  ;;  %v89_v14 = vsub.f32 %v79_v6, %v85_v10  ;;  %v104_v25 = vld [vmem:[#allocation2] sm:$0xff] (%p64_p2)  ;;  %p261_p3 = scmp.ne.s32.totalorder (%p64_p2), %s134_s12, %s260_s13  ;;  %p266_p5 = scmp.lt.s32.totalorder (%p64_p2), %s260_s13, %s260_s13 }
  0x30   : > { %v90_v15 = vsub.f32 %v80_v7, %v86_v11  ;;  %v91_v16 = vsub.f32 %v81_v8, %v87_v12  ;;  %66 = sbr.rel (!%p64_p2) target bundleno = 41 (0x29), region = 55  ;;  %v105_v26 = vld [vmem:[#allocation2 + $0x8] sm:$0xff] (%p64_p2)  ;;  %v106_v27 = vld [vmem:[#allocation2 + $0x10] sm:$0xff] (%p64_p2)  ;;  %v107_v31 = vld [vmem:[#allocation2 + $0x18] sm:$0xff] (%p64_p2) }
  0x31   : > { %v92_v17 = vmul.f32 %v88_v13, %v88_v13  ;;  %v93_v18 = vmul.f32 %v89_v14, %v89_v14  ;;  %p267_p6 = por (%p64_p2), %p266_p5, %p265_p4 }
  0x32   : > { %v94_v19 = vmul.f32 %v90_v15, %v90_v15  ;;  %v95_v20 = vmul.f32 %v91_v16, %v91_v16 }
  0x33   : > { %v100_v21 = vadd.f32 %v322_v4, %v92_v17   ;;  %v101_v22 = vadd.f32 %v318_v3, %v93_v18   ;;  %p268_p7 = pnand (%p64_p2), %p267_p6, %p261_p3 }
  0x34   : > { %v102_v23 = vadd.f32 %v314_v2, %v94_v19   ;;  %v103_v24 = vadd.f32 %v310_v1, %v95_v20  }
  0x35   : > { %v317_v3 = vmov %v101_v22   ;;  %v321_v4 = vmov %v100_v21   ;;  %v108_v28 = vadd.f32 (%p64_p2), %v104_v25, %v100_v21  ;;  %v109_v29 = vadd.f32 (%p64_p2), %v105_v26, %v101_v22 }
  0x36   : > { %v309_v1 = vmov %v103_v24   ;;  %v313_v2 = vmov %v102_v23   ;;  %v110_v30 = vadd.f32 (%p64_p2), %v106_v27, %v102_v23  ;;  %v111_v32 = vadd.f32 (%p64_p2), %v107_v31, %v103_v24 }
  0x37   :  { %112 = vst [vmem:[#allocation2] sm:$0xff] %v108_v28  ;;  %113 = vst [vmem:[#allocation2 + $0x8] sm:$0xff] %v109_v29 }
  0x38   :  { %114 = vst [vmem:[#allocation2 + $0x10] sm:$0xff] %v110_v30  ;;  %123 = vst [vmem:[#allocation8] sm:$0xff] %v108_v28 }
  0x39   :  { %124 = vst [vmem:[#allocation8 + $0x8] sm:$0xff] %v109_v29  ;;  %125 = vst [vmem:[#allocation8 + $0x10] sm:$0xff] %v110_v30 }
  0x3a   :  { %115 = vst [vmem:[#allocation2 + $0x18] sm:$0xff] %v111_v32  ;;  %126 = vst [vmem:[#allocation8 + $0x18] sm:$0xff] %v111_v32 }
  0x3b   :  { %271 = shalt.err (!%p268_p7)
}
  0x3c   :  { %s272_s16 = scalar_lea.hbm %s396_s2, 512 }
  0x3d   :  { %p273_p8 = scmp.ne.s32.totalorder %s396_s2, %s272_s16  ;;  %p276_p9 = scmp.lt.u32.totalorder %s272_s16, %s396_s2 }
  0x3f   :  { %p278_p10 = pnand %p276_p9, %p273_p8 }
  0x41   :  { %281 = shalt.err (!%p278_p10)
}
  0x42   :  { %136 = dma.vmem_to_hbm [thread:$0]  %s134_s12, 512, %s396_s2, [#allocation5]  }
  0x43   :  { %306 = dma.done.wait [#allocation5], 512  }
  0x44   :  { %307 = vsyncadd [#allocation5], 4294966784 }
  0x45   :  { %140 = vsyncpa [#allocation4], 1 }
  0x46   :  { %141 = vsyncpa [#allocation7], 1 }
  0x47   :  { %142 = vsyncpa [#allocation5], 1 }

</bundles_post_ra>
